<compile_context>
chip_gen: v5e
topology: v5e:2x2
jax: 0.10.0
libtpu: 0.0.40
codegen_flags: <defaults>
</compile_context>

<pallas_src>
import functools

import jax
import jax.numpy as jnp
from jax.experimental import pallas as pl
from jax.experimental.pallas import tpu as pltpu


def _cdiv(a, b):
    return (a + b - 1) // b


def _round_up(x, m):
    return ((x + m - 1) // m) * m


def _device_kind():
    try:
        return jax.devices()[0].device_kind.lower()
    except Exception:
        return ""


def _vmem_capacity_bytes(kind):
    try:
        info = pltpu.get_tpu_info()
        cap = getattr(info, "vmem_capacity_bytes", None)
        if cap:
            return int(cap)
    except Exception:
        pass
    # Fallback guess: v7x has 64 MiB per TensorCore, older parts 128 MiB.
    return (64 if "v7" in kind else 128) * 1024 * 1024


def _num_tensorcores(kind):
    # 2 TCs per chip on v7x and megacore parts (v4/v5p); v5e/v6e are 1 TC.
    if any(k in kind for k in ("v7", "v4", "v5p")):
        return 2
    return 1


def _auto_compute_dtype(pred_dtype, kind):
    # bf16 VPU/EUP exist on v6e/v7x; keep f32 on-core math elsewhere.
    if jnp.dtype(pred_dtype) == jnp.dtype(jnp.bfloat16) and any(
            k in kind for k in ("v6", "v7")):
        return jnp.bfloat16
    return jnp.float32


def _label_smoothing_kernel(pred_ref, target_ref, out_ref, acc_ref, *,
                            n_total, block_rows, blocks_per_core,
                            classes, smoothing, compute_dtype, inv_n):
    p = pl.program_id(0)          # core / partial-sum index ("parallel")
    i = pl.program_id(1)          # row-block index ("arbitrary", accumulated)

    @pl.when(i == 0)
    def _init():
        acc_ref[0] = jnp.float32(0.0)

    confidence = 1.0 - smoothing
    smooth_val = smoothing / (classes - 1)

    pred = pred_ref[...]
    if pred.dtype != compute_dtype:
        pred = pred.astype(compute_dtype)
    tgt = target_ref[...]                             # (TN, 1), int32
    tn, c = pred.shape

    # Row-validity mask: handles N not a multiple of TN and fully-padded
    # (clamped duplicate) blocks introduced by the per-core split.
    b = p * blocks_per_core + i                       # logical row-block index
    row_ids = b * block_rows + jax.lax.broadcasted_iota(jnp.int32, (tn, 1), 0)
    valid = row_ids < n_total                         # (TN, 1) bool

    # Single lane-row of class ids; the compare broadcasts it against tgt.
    cls_row = jax.lax.broadcasted_iota(jnp.int32, (1, c), 1)     # (1, C)

    # Stable row-wise log-sum-exp: elementwise in compute_dtype, f32 accumulate.
    m = jnp.max(pred, axis=-1, keepdims=True)
    e = jnp.exp(pred - m)
    sum_e = jnp.sum(e, axis=-1, keepdims=True, dtype=jnp.float32)
    lse = m.astype(jnp.float32) + jnp.log(sum_e)                 # (TN, 1)

    # Fused scatter-free identity:
    #   sum_c -true_dist*logp = lse - sum_c(w_c * pred_c),
    #   w_c = confidence if c == target else smooth_val.
    w = jnp.where(cls_row == tgt,
                  jnp.asarray(confidence, dtype=compute_dtype),
                  jnp.asarray(smooth_val, dtype=compute_dtype))  # (TN, C)
    wsum = jnp.sum(pred * w, axis=-1, keepdims=True, dtype=jnp.float32)

    per_row = jnp.where(valid, lse - wsum, 0.0)

    # Pre-scale each block by 1/N before accumulating (precision for huge N);
    # the sum of per-core partials is then already the mean.
    acc_ref[0] = acc_ref[0] + jnp.sum(per_row) * jnp.float32(inv_n)

    @pl.when(i == pl.num_programs(1) - 1)
    def _finalize():
        out_ref[...] = jnp.full(out_ref.shape, acc_ref[0], jnp.float32)


def label_smoothing_loss(pred, target, *, classes, smoothing=0.0,
                         block_rows=None, num_cores=None, compute_dtype=None):
    """pred: (N, C) float (f32 or bf16), target: (N,) int. Returns scalar f32."""
    n, c = pred.shape
    assert c == classes
    assert classes >= 2, "label smoothing needs at least 2 classes"
    target2d = target.astype(jnp.int32).reshape(n, 1)

    kind = _device_kind()
    if compute_dtype is None:
        compute_dtype = _auto_compute_dtype(pred.dtype, kind)
    vmem = _vmem_capacity_bytes(kind)
    budget = (vmem * 3) // 8              # ~24 MiB on v7x, ~48 MiB on v5e/v6e
    vmem_limit = (vmem * 3) // 4          # ~48 MiB on v7x, ~96 MiB on v5e/v6e

    itemsize = jnp.dtype(pred.dtype).itemsize
    comp_itemsize = jnp.dtype(compute_dtype).itemsize
    if block_rows is None:
        # Bytes-driven: double-buffered input + compute-dtype temporaries +
        # f32 row accumulators; rows a multiple of 8, no artificial row cap.
        per_row_bytes = c * (2 * itemsize + 4 * comp_itemsize + 8)
        tn = budget // max(per_row_bytes, 1)
        tn = max(8, min(tn, 16384, _round_up(n, 8)))
        block_rows = int((tn // 8) * 8)
    assert block_rows % 8 == 0

    total_blocks = _cdiv(n, block_rows)
    if num_cores is None:
        num_cores = _num_tensorcores(kind)
    ncores = max(1, min(int(num_cores), total_blocks))
    blocks_per_core = _cdiv(total_blocks, ncores)

    def row_block(p, i):
        # Clamp so fully-out-of-range steps just re-read the last block; the
        # kernel's row mask zeroes their contribution.
        return (jnp.minimum(p * blocks_per_core + i, total_blocks - 1), 0)

    kernel = functools.partial(
        _label_smoothing_kernel,
        n_total=n, block_rows=block_rows, blocks_per_core=blocks_per_core,
        classes=classes, smoothing=float(smoothing),
        compute_dtype=compute_dtype, inv_n=1.0 / n)

    partials = pl.pallas_call(
        kernel,
        out_shape=jax.ShapeDtypeStruct((ncores, 1, 1), jnp.float32),
        grid_spec=pltpu.PrefetchScalarGridSpec(
            num_scalar_prefetch=0,
            grid=(ncores, blocks_per_core),
            in_specs=[
                pl.BlockSpec((block_rows, c), row_block),   # pred tile
                pl.BlockSpec((block_rows, 1), row_block),   # target tile
            ],
            out_specs=pl.BlockSpec((1, 1, 1), lambda p, i: (p, 0, 0)),
            scratch_shapes=[pltpu.SMEM((1,), jnp.float32)],
        ),
        compiler_params=pltpu.CompilerParams(
            dimension_semantics=("parallel", "arbitrary"),
            vmem_limit_bytes=int(vmem_limit)),
    )(pred, target2d)

    # Per-block sums were pre-scaled by 1/N; summing partials gives the mean.
    return jnp.sum(partials[:, 0, 0])


def _reference(pred, target, classes, smoothing):
    # Pure-JAX reference of the PyTorch forward.
    logp = jax.nn.log_softmax(pred.astype(jnp.float32), axis=-1)
    true_dist = jnp.full_like(logp, smoothing / (classes - 1))
    true_dist = true_dist.at[jnp.arange(pred.shape[0]), target].set(1.0 - smoothing)
    return jnp.mean(jnp.sum(-true_dist * logp, axis=-1))


if __name__ == "__main__":
    N, C = 30, 32          # N deliberately not a multiple of 8 to exercise masking
    smoothing = 0.1
    key = jax.random.PRNGKey(0)
    k1, k2 = jax.random.split(key)
    pred = jax.random.normal(k1, (N, C), dtype=jnp.float32)
    target = jax.random.randint(k2, (N,), 0, C, dtype=jnp.int32)

    ref = _reference(pred, target, C, smoothing)

    # Default tiling (single row-block on most configs).
    loss = jax.block_until_ready(
        label_smoothing_loss(pred, target, classes=C, smoothing=smoothing))
    assert jnp.allclose(loss, ref, atol=1e-5, rtol=1e-5), (loss, ref)

    # Small tiles + forced 2-core split: exercises the grid accumulator,
    # per-core partials, clamped duplicate blocks and row masking.
    loss_tiled = jax.block_until_ready(
        label_smoothing_loss(pred, target, classes=C, smoothing=smoothing,
                             block_rows=8, num_cores=2))
    assert jnp.allclose(loss_tiled, ref, atol=1e-5, rtol=1e-5), (loss_tiled, ref)

    # bf16 HBM storage with f32 on-core math (exact-ish path).
    pred_bf16 = pred.astype(jnp.bfloat16)
    ref_bf16 = _reference(pred_bf16, target, C, smoothing)
    loss_bf16_f32 = jax.block_until_ready(
        label_smoothing_loss(pred_bf16, target, classes=C, smoothing=smoothing,
                             compute_dtype=jnp.float32))
    assert jnp.allclose(loss_bf16_f32, ref_bf16, atol=1e-5, rtol=1e-5), (
        loss_bf16_f32, ref_bf16)

    # bf16 HBM storage with auto compute dtype (bf16 on-core math on v6e/v7x;
    # reductions accumulate in f32) -- looser tolerance for the bf16 vector path.
    loss_bf16 = jax.block_until_ready(
        label_smoothing_loss(pred_bf16, target, classes=C, smoothing=smoothing))
    assert jnp.allclose(loss_bf16, ref_bf16, atol=5e-2, rtol=5e-2), (
        loss_bf16, ref_bf16)

    print("KERNEL_OK")
</pallas_src>

<mosaic_0001>
module attributes {stable_mosaic.version = 11 : i64} {
  func.func @_label_smoothing_kernel(%arg0: i32, %arg1: i32, %arg2: memref<32x32xf32, #tpu.memory_space<vmem>>, %arg3: memref<32x1xi32, #tpu.memory_space<vmem>>, %arg4: memref<1x1x1xf32, #tpu.memory_space<vmem>>, %arg5: memref<1xf32, #tpu.memory_space<smem>>) attributes {dimension_semantics = [#tpu.dimension_semantics<parallel>, #tpu.dimension_semantics<arbitrary>], iteration_bounds = array<i64: 1, 1>, scalar_prefetch = 0 : i64, scratch_operands = 1 : i64, tpu.core_type = #tpu.core_type<tc>, window_params = [{transform_indices = @transform_0, window_bounds = array<i64: 32, 32>}, {transform_indices = @transform_1, window_bounds = array<i64: 32, 1>}, {transform_indices = @transform_2, window_bounds = array<i64: 1, 1, 1>}]} {
    %c0_i32 = arith.constant 0 : i32
    %0 = arith.cmpi eq, %arg1, %c0_i32 : i32
    %1 = arith.extui %0 : i1 to i32
    %c0_i32_0 = arith.constant 0 : i32
    %2 = arith.cmpi ne, %1, %c0_i32_0 : i32
    scf.if %2 {
      %cst_15 = arith.constant 0.000000e+00 : f32
      %c0_16 = arith.constant 0 : index
      %46 = memref.load %arg5[%c0_16] : memref<1xf32, #tpu.memory_space<smem>>
      memref.store %cst_15, %arg5[%c0_16] : memref<1xf32, #tpu.memory_space<smem>>
    } else {
    }
    %c0 = arith.constant 0 : index
    %c0_1 = arith.constant 0 : index
    %3 = vector.load %arg2[%c0, %c0_1] : memref<32x32xf32, #tpu.memory_space<vmem>>, vector<32x32xf32>
    %c0_2 = arith.constant 0 : index
    %c0_3 = arith.constant 0 : index
    %4 = vector.load %arg3[%c0_2, %c0_3] : memref<32x1xi32, #tpu.memory_space<vmem>>, vector<32x1xi32>
    %c1_i32 = arith.constant 1 : i32
    %5 = arith.muli %arg0, %c1_i32 : i32
    %6 = arith.addi %5, %arg1 : i32
    %c32_i32 = arith.constant 32 : i32
    %7 = arith.muli %6, %c32_i32 : i32
    %8 = tpu.iota {dimensions = array<i32: 0>} : vector<32x1xi32>
    %9 = vector.broadcast %7 : i32 to vector<32x1xi32>
    %10 = arith.addi %9, %8 : vector<32x1xi32>
    %c30_i32 = arith.constant 30 : i32
    %11 = vector.broadcast %c30_i32 : i32 to vector<32x1xi32>
    %12 = arith.cmpi slt, %10, %11 : vector<32x1xi32>
    %13 = tpu.iota {dimensions = array<i32: 1>} : vector<1x32xi32>
    %cst = arith.constant dense<0xFF800000> : vector<32xf32>
    %14 = vector.multi_reduction <maximumf>, %3, %cst [1] : vector<32x32xf32> to vector<32xf32>
    %15 = vector.shape_cast %14 : vector<32xf32> to vector<32x1xf32>
    %16 = vector.broadcast %15 : vector<32x1xf32> to vector<32x32xf32>
    %17 = arith.subf %3, %16 : vector<32x32xf32>
    %18 = math.exp %17 : vector<32x32xf32>
    %cst_4 = arith.constant dense<0.000000e+00> : vector<32xf32>
    %19 = vector.multi_reduction <add>, %18, %cst_4 [1] : vector<32x32xf32> to vector<32xf32>
    %20 = vector.shape_cast %19 : vector<32xf32> to vector<32x1xf32>
    %21 = math.log %20 : vector<32x1xf32>
    %22 = arith.addf %15, %21 : vector<32x1xf32>
    %23 = vector.broadcast %13 : vector<1x32xi32> to vector<32x32xi32>
    %24 = vector.broadcast %4 : vector<32x1xi32> to vector<32x32xi32>
    %25 = arith.cmpi eq, %23, %24 : vector<32x32xi32>
    %cst_5 = arith.constant 0.899999976 : f32
    %cst_6 = arith.constant 0.0032258064 : f32
    %26 = vector.broadcast %cst_5 : f32 to vector<32x32xf32>
    %27 = vector.broadcast %cst_6 : f32 to vector<32x32xf32>
    %28 = arith.select %25, %26, %27 : vector<32x32xi1>, vector<32x32xf32>
    %29 = arith.mulf %3, %28 : vector<32x32xf32>
    %cst_7 = arith.constant dense<0.000000e+00> : vector<32xf32>
    %30 = vector.multi_reduction <add>, %29, %cst_7 [1] : vector<32x32xf32> to vector<32xf32>
    %31 = vector.shape_cast %30 : vector<32xf32> to vector<32x1xf32>
    %32 = arith.subf %22, %31 : vector<32x1xf32>
    %cst_8 = arith.constant 0.000000e+00 : f32
    %33 = vector.broadcast %cst_8 : f32 to vector<32x1xf32>
    %34 = arith.select %12, %32, %33 : vector<32x1xi1>, vector<32x1xf32>
    %c0_9 = arith.constant 0 : index
    %35 = memref.load %arg5[%c0_9] : memref<1xf32, #tpu.memory_space<smem>>
    %36 = vector.shape_cast %34 : vector<32x1xf32> to vector<1x32x1xf32>
    %cst_10 = arith.constant dense<0.000000e+00> : vector<1xf32>
    %37 = vector.multi_reduction <add>, %36, %cst_10 [1, 2] : vector<1x32x1xf32> to vector<1xf32>
    %38 = vector.shape_cast %37 : vector<1xf32> to vector<1x1x1xf32>
    %39 = vector.extract %38[0, 0, 0] : f32 from vector<1x1x1xf32>
    %cst_11 = arith.constant 0.0333333351 : f32
    %40 = arith.mulf %39, %cst_11 : f32
    %41 = arith.addf %35, %40 : f32
    %c0_12 = arith.constant 0 : index
    %42 = memref.load %arg5[%c0_12] : memref<1xf32, #tpu.memory_space<smem>>
    memref.store %41, %arg5[%c0_12] : memref<1xf32, #tpu.memory_space<smem>>
    %c0_i32_13 = arith.constant 0 : i32
    %43 = arith.cmpi eq, %arg1, %c0_i32_13 : i32
    %44 = arith.extui %43 : i1 to i32
    %c0_i32_14 = arith.constant 0 : i32
    %45 = arith.cmpi ne, %44, %c0_i32_14 : i32
    scf.if %45 {
      %c0_15 = arith.constant 0 : index
      %46 = memref.load %arg5[%c0_15] : memref<1xf32, #tpu.memory_space<smem>>
      %47 = vector.broadcast %46 : f32 to vector<1x1x1xf32>
      %c0_16 = arith.constant 0 : index
      %c0_17 = arith.constant 0 : index
      %c0_18 = arith.constant 0 : index
      %48 = vector.load %arg4[%c0_16, %c0_17, %c0_18] : memref<1x1x1xf32, #tpu.memory_space<vmem>>, vector<1x1x1xf32>
      tpu.vector_store %arg4[%c0_16, %c0_17, %c0_18], %47 {strides = array<i32>} : memref<1x1x1xf32, #tpu.memory_space<vmem>>, vector<1x1x1xf32>,
    } else {
    }
    return
  }
  func.func @transform_0(%arg0: i32, %arg1: i32) -> (i32, i32) {
    %c1_i32 = arith.constant 1 : i32
    %0 = arith.muli %arg0, %c1_i32 : i32
    %1 = arith.addi %0, %arg1 : i32
    %c0_i32 = arith.constant 0 : i32
    %2 = arith.minsi %1, %c0_i32 : i32
    %c0_i32_0 = arith.constant 0 : i32
    %c0_i32_1 = arith.constant 0 : i32
    return %2, %c0_i32_0 : i32, i32
  }
  func.func @transform_1(%arg0: i32, %arg1: i32) -> (i32, i32) {
    %c1_i32 = arith.constant 1 : i32
    %0 = arith.muli %arg0, %c1_i32 : i32
    %1 = arith.addi %0, %arg1 : i32
    %c0_i32 = arith.constant 0 : i32
    %2 = arith.minsi %1, %c0_i32 : i32
    %c0_i32_0 = arith.constant 0 : i32
    %c0_i32_1 = arith.constant 0 : i32
    return %2, %c0_i32_0 : i32, i32
  }
  func.func @transform_2(%arg0: i32, %arg1: i32) -> (i32, i32, i32) {
    %c0_i32 = arith.constant 0 : i32
    %c0_i32_0 = arith.constant 0 : i32
    %c0_i32_1 = arith.constant 0 : i32
    return %arg0, %c0_i32, %c0_i32_0 : i32, i32, i32
  }
}

</mosaic_0001>

<bundles_post_ra>
// kernel: tpu_custom_call.1
= control target key start
LH: loop header
LB: loop body
LE: loop exit
PB: predicated region body
PF: predicated region fallthrough
CT: control target
= control target key end

     0   :  { %vm108_vm0 = vcmask 261120   ;;  %v308_v4 = vmov 0   ;;  %s388_s0 = inlined_call_operand.vmem [shape: f32[30,32], index: 0, kind: input, shape index: {}]   ;;  %s389_s1 = inlined_call_operand.vmem [shape: s32[30,1], index: 1, kind: input, shape index: {}]   ;;  %s390_s2 = inlined_call_operand.hbm [shape: f32[1,1,1], index: 2, kind: output, shape index: {}]  }
   0x1   :  { %v329_v0 = vld [vmem:[%s388_s0 + $0x10] sm:$0xff]  ;;  %v82_v1 = vld [vmem:[%s388_s0] sm:$0xff]  ;;  %263 = vset.pattern.permute.xlu2 %v308_v4  ;;  %265 = vset.pattern.permute.xlu1 %v308_v4 }
   0x2   :  { %v115_v2 = vsel %vm108_vm0, %v329_v0, -inf  ;;  %v109_v3 = vsel %vm108_vm0, %v82_v1, -inf  ;;  %v86_v5 = vld [vmem:[%s389_s1] sm:$0xff] }
   0x3   :  { %116 = vmax.xlane.f32.xlu1 %v115_v2  ;;  %110 = vmax.xlane.f32.xlu0 %v109_v3 }
   0x4   :  { %7 = vsyncpa [#allocation4], 0  ;;  %158 = vperm.xlu2 %263, %v86_v5   ;;  %264 = vset.pattern.permute.xlu0 %v308_v4  ;;  %v83_v6 = vld [vmem:[%s388_s0 + $0x8] sm:$0xff]  ;;  %v85_v7 = vld [vmem:[%s388_s0 + $0x18] sm:$0xff]  ;;  %v92_v17 = vlaneseq  ;;  %v309_v29 = vmov 0.0032258064  }
   0x5   :  { %v112_v8 = vsel %vm108_vm0, %v83_v6, -inf  ;;  %v118_v9 = vsel %vm108_vm0, %v85_v7, -inf  ;;  %v87_v10 = vld [vmem:[%s389_s1 + $0x8] sm:$0xff]  ;;  %v88_v11 = vld [vmem:[%s389_s1 + $0x10] sm:$0xff]  ;;  %v89_v12 = vld [vmem:[%s389_s1 + $0x18] sm:$0xff]  ;;  %vm202_vm5 = vcmask 7168  }
   0x6   :  { %v107_v20 = vand.u32 127, %v92_v17  ;;  %v93_v62 = vshrl.u32 %v92_v17, 7  ;;  %s310_s0 = smov [#allocation3]   ;;  %s237_s27 = sshll.u32 %s390_s2, 4  ;;  %vm228_vm7 = vcmask 0   ;;  %s238_s27 = int_to_ptr.hbm [resolvable:$true] %s237_s27 }
   0x7   :  { %s235_s1 = sshll.u32 %s310_s0, 4  ;;  %s236_s1 = int_to_ptr.vmem [resolvable:$true] %s235_s1 }
   0xb   :  { %113 = vmax.xlane.f32.xlu0 %v112_v8  ;;  %119 = vmax.xlane.f32.xlu1 %v118_v9 }
   0xc   :  { %161 = vperm.xlu2 %263, %v87_v10  }
  0x1f   :  { %164 = vperm.xlu0 %264, %v88_v11  }
  0x24   :  { %167 = vperm.xlu1 %265, %v89_v12  }
  0x5e   :  { %v159_v21 = vpop.permute.xlu2 %158 }
  0x5f   :  { %vm169_vm1 = vcmp.eq.s32.totalorder %v107_v20, %v159_v21 }
  0x60   :  { %v173_v30 = vsel %vm169_vm1, 0.9, %v309_v29 }
  0x61   :  { %v177_v34 = vmul.f32 %v173_v30, %v82_v1 }
  0x63   :  { %v181_v36 = vsel %vm108_vm0, %v177_v34, 0.0 }
  0x66   :  { %v162_v39 = vpop.permute.xlu2 %161 }
  0x67   :  { %vm170_vm2 = vcmp.eq.s32.totalorder %v107_v20, %v162_v39 }
  0x68   :  { %v174_v41 = vsel %vm170_vm2, 0.9, %v309_v29 }
  0x69   :  { %v178_v44 = vmul.f32 %v174_v41, %v83_v6 }
  0x6b   :  { %v184_v48 = vsel %vm108_vm0, %v178_v44, 0.0 }
  0x76   :  { %v357_v13 = vpop.xlane.xlu1 %116  ;;  %v359_v14 = vpop.xlane.xlu0 %110 }
  0x77   :  { %v123_v15 = vsub.f32 %v329_v0, %v357_v13  ;;  %v121_v16 = vsub.f32 %v82_v1, %v359_v14 }
  0x79   :  { %v129_v18 = vmul.f32 1.442695, %v123_v15  ;;  %v125_v19 = vmul.f32 1.442695, %v121_v16 }
  0x7b   :  { %266 = vpow2.f32 %v129_v18 }
  0x7c   :  { %268 = vpow2.f32 %v125_v19 }
  0x7e   :  { %v365_v22 = vpop.xlane.xlu0 %113  ;;  %v367_v23 = vpop.xlane.xlu1 %119 }
  0x7f   :  { %v122_v24 = vsub.f32 %v83_v6, %v365_v22  ;;  %v124_v25 = vsub.f32 %v85_v7, %v367_v23 }
  0x81   :  { %v267_v26 = vpop.eup %266  ;;  %v127_v27 = vmul.f32 1.442695, %v122_v24  ;;  %v131_v33 = vmul.f32 1.442695, %v124_v25 }
  0x82   :  { %v269_v28 = vpop.eup %268  ;;  %v139_v31 = vsel %vm108_vm0, %v267_v26, 0.0 }
  0x83   :  { %270 = vpow2.f32 %v127_v27  ;;  %140 = vadd.xlane.f32.xlu0 %v139_v31  ;;  %v133_v32 = vsel %vm108_vm0, %v269_v28, 0.0 }
  0x84   :  { %134 = vadd.xlane.f32.xlu2 %v133_v32  ;;  %272 = vpow2.f32 %v131_v33 }
  0x89   :  { %v271_v35 = vpop.eup %270 }
  0x8a   :  { %v136_v37 = vsel %vm108_vm0, %v271_v35, 0.0  ;;  %v273_v38 = vpop.eup %272 }
  0x8b   :  { %137 = vadd.xlane.f32.xlu1 %v136_v37  ;;  %v142_v40 = vsel %vm108_vm0, %v273_v38, 0.0 }
  0x8c   :  { %182 = vadd.xlane.f32.xlu2 %v181_v36 }
  0x91   :  { %v165_v42 = vpop.permute.xlu0 %164 }
  0x92   :  { %vm171_vm4 = vcmp.eq.s32.totalorder %v107_v20, %v165_v42 }
  0x93   :  { %v175_v47 = vsel %vm171_vm4, 0.9, %v309_v29 }
  0x94   :  { %143 = vadd.xlane.f32.xlu2 %v142_v40  ;;  %v179_v50 = vmul.f32 %v175_v47, %v329_v0 }
  0x96   :  { %v168_v43 = vpop.permute.xlu1 %167  ;;  %v187_v51 = vsel %vm108_vm0, %v179_v50, 0.0 }
  0x97   :  { %vm172_vm3 = vcmp.eq.s32.totalorder %v107_v20, %v168_v43 }
  0x98   :  { %v176_v45 = vsel %vm172_vm3, 0.9, %v309_v29 }
  0x99   :  { %v180_v46 = vmul.f32 %v176_v45, %v85_v7  ;;  %v96_v7 = vadd.s32 24, %v93_v62 }
  0x9b   :  { %v190_v49 = vsel %vm108_vm0, %v180_v46, 0.0  ;;  %vm105_vm6 = vcmp.lt.s32.totalorder %v96_v7, 30 }
  0x9c   :  { %185 = vadd.xlane.f32.xlu2 %v184_v48  ;;  %191 = vadd.xlane.f32.xlu1 %v190_v49 }
  0xa4   :  { %188 = vadd.xlane.f32.xlu2 %v187_v51 }
  0xf6   :  { %v141_v55 = vpop.xlane.xlu0 %140 }
  0xf7   :  { %v135_v52 = vpop.xlane.xlu2 %134 }
  0xf8   :  { %274 = vlog2.f32 %v135_v52 }
  0xfe   :  { %v138_v54 = vpop.xlane.xlu1 %137  ;;  %v275_v57 = vpop.eup %274 }
  0xff   :  { %v183_v53 = vpop.xlane.xlu2 %182  ;;  %276 = vlog2.f32 %v138_v54  ;;  %v146_v59 = vmul.f32 0.6931472, %v275_v57 }
 0x101   :  { %v153_v2 = vadd.f32 %v146_v59, %v359_v14 }
 0x103   :  { %v193_v9 = vsub.f32 %v153_v2, %v183_v53 }
 0x105   :  { %v277_v58 = vpop.eup %276  ;;  %v203_v16 = vsel %vm202_vm5, %v193_v9, 0.0 }
 0x106   :  { %v148_v60 = vmul.f32 0.6931472, %v277_v58 }
 0x107   :  { %v144_v56 = vpop.xlane.xlu2 %143 }
 0x108   :  { %278 = vlog2.f32 %v144_v56  ;;  %v154_v3 = vadd.f32 %v148_v60, %v365_v22 }
 0x109   :  { %280 = vlog2.f32 %v141_v55 }
 0x10e   :  { %v279_v61 = vpop.eup %278 }
 0x10f   :  { %v281_v63 = vpop.eup %280  ;;  %v152_v0 = vmul.f32 0.6931472, %v279_v61  ;;  %v186_v1 = vpop.xlane.xlu2 %185 }
 0x110   :  { %v150_v5 = vmul.f32 0.6931472, %v281_v63  ;;  %v194_v6 = vsub.f32 %v154_v3, %v186_v1  ;;  %v192_v8 = vpop.xlane.xlu1 %191 }
 0x111   :  { %v156_v4 = vadd.f32 %v152_v0, %v367_v23 }
 0x112   :  { %v204_v11 = vsel %vm202_vm5, %v194_v6, 0.0  ;;  %v155_v12 = vadd.f32 %v150_v5, %v357_v13 }
 0x113   :  { %v196_v10 = vsub.f32 %v156_v4, %v192_v8  ;;  %v205_v18 = vadd.f32 %v204_v11, %v203_v16 }
 0x115   :  { %v200_v14 = vsel %vm105_vm6, %v196_v10, 0.0 }
 0x116   :  { %v208_v21 = vsel %vm202_vm5, %v200_v14, 0.0 }
 0x117   :  { %v189_v15 = vpop.xlane.xlu2 %188 }
 0x118   :  { %v195_v17 = vsub.f32 %v155_v12, %v189_v15 }
 0x11a   :  { %v206_v19 = vsel %vm202_vm5, %v195_v17, 0.0 }
 0x11b   :  { %v207_v20 = vadd.f32 %v206_v19, %v205_v18 }
 0x11d   :  { %v209_v22 = vadd.f32 %v208_v21, %v207_v20 }
 0x11f   :  { %210 = vadd.xlane.f32.xlu2 %v209_v22 }
 0x192   :  { %v211_v23 = vpop.xlane.xlu2 %210 }
 0x193   :  { %v212_v24 = vrot.slane %v211_v23, 4 }
 0x195   :  { %v213_v25 = vadd.f32 %v212_v24, %v211_v23 }
 0x197   :  { %v214_v26 = vrot.slane %v213_v25, 2 }
 0x199   :  { %v215_v27 = vadd.f32 %v214_v26, %v213_v25 }
 0x19b   :  { %v216_v28 = vrot.slane %v215_v27, 1 }
 0x19d   :  { %v217_v29 = vadd.f32 %v216_v28, %v215_v27 }
 0x19f   :  { %258 = vpush %v217_v29 }
 0x1d0   :  { %s259_s28 = spop %258 }
 0x1d1   :  { %s219_s29 = smul.f32 0.033333335, %s259_s28 }
 0x1d3   :  { %v227_v13 = vstv %s219_s29 }
 0x1d4   :  { %229 = vst.msk [vmem:[#allocation3] sm:$0x1] %vm228_vm7, %v227_v13 }
 0x1d5   :  { %240 = dma.vmem_to_hbm [thread:$0]  %s236_s1, 16, %s238_s27, [#allocation4]  }
 0x1d6   :  { %306 = dma.done.wait [#allocation4], 16  }
 0x1d7   :  { %307 = vsyncadd [#allocation4], 4294967280 }
 0x1d8   :  { %245 = vsyncpa [#allocation4], 1 }

</bundles_post_ra>
